<compile_context>
chip_gen: v7x
topology: tpu7x:2x2x1
jax: 0.10.0
libtpu: 0.0.40
codegen_flags: <defaults>
</compile_context>

<pallas_src>
import functools

import jax
import jax.numpy as jnp
from jax.experimental import pallas as pl
from jax.experimental.pallas import tpu as pltpu


def _subnet_kernel(x_ref, wih_ref, whh_ref, b_ref, wlin_ref, blin_ref,
                   y_ref, *, seq_len, batch_padded):
    """Single-invocation SubNet forward (everything resident in VMEM).

    x_ref    : (S*Bp, D_in)   time-major, batch padded to a multiple of 8
    wih_ref  : (D_in, 4H)     W_ih^T
    whh_ref  : (H, 4H)        W_hh^T
    b_ref    : (1, 4H)        b_ih + b_hh
    wlin_ref : (H, N_pad)     W_lin^T, lane-padded to a multiple of 128
    blin_ref : (1, N_pad)
    y_ref    : (S*Bp, N_pad)  time-major, lane-dense output slab
    """
    Bp = batch_padded
    H = whh_ref.shape[0]

    # (a) Input projection for ALL timesteps in one MXU matmul, LSTM biases
    #     folded in (hoisted out of the recurrence).
    xw = (jnp.dot(x_ref[...], wih_ref[...], preferred_element_type=jnp.float32)
          + b_ref[...])                                        # (S*Bp, 4H)

    whh = whh_ref[...]                                         # (H, 4H)

    h = jnp.zeros((Bp, H), jnp.float32)
    c = jnp.zeros((Bp, H), jnp.float32)
    hs = []

    # (b) Fully-unrolled recurrence (S is static). Per step: one tile-aligned
    #     (8,128) slice of xw, one small h-dependent MXU matmul, gate math on
    #     VPU/EUP. h/c and all h_t stay in vregs.
    for t in range(seq_len):
        gates = xw[t * Bp:(t + 1) * Bp, :] + jnp.dot(
            h, whh, preferred_element_type=jnp.float32)        # (Bp, 4H)

        sg = jax.nn.sigmoid(gates)                             # i, f, o need it
        g_g = jnp.tanh(gates[:, 2 * H:3 * H])                  # cell candidate only
        i_g = sg[:, 0 * H:1 * H]
        f_g = sg[:, 1 * H:2 * H]
        o_g = sg[:, 3 * H:4 * H]

        c = f_g * c + i_g * g_g
        h = o_g * jnp.tanh(c)
        hs.append(h)

    # (c) dropout is identity (num_layers == 1 -> p = 0).
    # (d) Linear + ReLU for ALL timesteps: one MXU matmul and one dense,
    #     lane-aligned store of the whole output slab.
    hs_all = jnp.concatenate(hs, axis=0)                       # (S*Bp, H)
    y = (jnp.dot(hs_all, wlin_ref[...], preferred_element_type=jnp.float32)
         + blin_ref[...])                                      # (S*Bp, N_pad)
    y_ref[...] = jnp.maximum(y, 0.0).astype(y_ref.dtype)


@jax.jit
def subnet_forward(x, w_ih, w_hh, b_ih, b_hh, w_lin, b_lin):
    """x: (batch, seq_len, in_size). Returns (batch, seq_len, out_size)."""
    B, S, D_in = x.shape
    H4 = w_ih.shape[0]
    H = H4 // 4
    D_out = w_lin.shape[0]

    B_pad = ((B + 7) // 8) * 8                 # sublane-aligned per-step tiles
    N_pad = ((D_out + 127) // 128) * 128       # lane-dense output store

    # Weight layout prep (plain (M,K)@(K,N) matmuls inside the kernel).
    wih_t = jnp.transpose(w_ih).astype(jnp.float32)                    # (D_in, 4H)
    whh_t = jnp.transpose(w_hh).astype(jnp.float32)                    # (H, 4H)
    b = (b_ih + b_hh).reshape(1, 4 * H).astype(jnp.float32)            # (1, 4H)
    wlin_t = jnp.zeros((H, N_pad), jnp.float32).at[:, :D_out].set(
        jnp.transpose(w_lin).astype(jnp.float32))                      # (H, N_pad)
    blin = jnp.zeros((1, N_pad), jnp.float32).at[:, :D_out].set(
        b_lin.astype(jnp.float32))                                     # (1, N_pad)

    # Pad batch to a full sublane tile, go time-major, flatten. All of this is
    # tiny layout plumbing fused under the enclosing jit.
    x_p = jnp.zeros((B_pad, S, D_in), jnp.float32).at[:B].set(x.astype(jnp.float32))
    x_flat = jnp.transpose(x_p, (1, 0, 2)).reshape(S * B_pad, D_in)

    kernel = functools.partial(_subnet_kernel, seq_len=S, batch_padded=B_pad)

    y_flat = pl.pallas_call(
        kernel,
        out_shape=jax.ShapeDtypeStruct((S * B_pad, N_pad), jnp.float32),
        in_specs=[pl.BlockSpec(memory_space=pltpu.MemorySpace.VMEM)] * 6,
        out_specs=pl.BlockSpec(memory_space=pltpu.MemorySpace.VMEM),
    )(x_flat, wih_t, whh_t, b, wlin_t, blin)

    y = y_flat.reshape(S, B_pad, N_pad)[:, :B, :D_out]     # drop pad rows/lanes
    return jnp.transpose(y, (1, 0, 2))                     # (B, S, D_out)


def _reference_forward(x, w_ih, w_hh, b_ih, b_hh, w_lin, b_lin):
    """Pure-JAX reference of SubNet.forward (num_layers=1, unidirectional, eval)."""
    B, S, _ = x.shape
    H = w_hh.shape[1]
    bias = b_ih + b_hh

    def step(carry, x_t):
        h, c = carry
        gates = x_t @ w_ih.T + h @ w_hh.T + bias
        i_g = jax.nn.sigmoid(gates[:, 0 * H:1 * H])
        f_g = jax.nn.sigmoid(gates[:, 1 * H:2 * H])
        g_g = jnp.tanh(gates[:, 2 * H:3 * H])
        o_g = jax.nn.sigmoid(gates[:, 3 * H:4 * H])
        c = f_g * c + i_g * g_g
        h = o_g * jnp.tanh(c)
        return (h, c), h

    h0 = jnp.zeros((B, H), jnp.float32)
    c0 = jnp.zeros((B, H), jnp.float32)
    _, hs = jax.lax.scan(step, (h0, c0), jnp.transpose(x, (1, 0, 2)))
    y = jnp.transpose(hs, (1, 0, 2))             # (B, S, H)
    return jnp.maximum(y @ w_lin.T + b_lin, 0.0)


if __name__ == "__main__":
    # Small shapes consistent with the module.
    batch, seq_len, in_size, hidden_size, out_size = 4, 8, 16, 32, 8

    key = jax.random.PRNGKey(0)
    ks = jax.random.split(key, 7)
    # PyTorch default init: U(-1/sqrt(H), 1/sqrt(H)) for both LSTM and Linear.
    bound = 1.0 / jnp.sqrt(jnp.float32(hidden_size))
    w_ih = jax.random.uniform(ks[0], (4 * hidden_size, in_size), jnp.float32, -bound, bound)
    w_hh = jax.random.uniform(ks[1], (4 * hidden_size, hidden_size), jnp.float32, -bound, bound)
    b_ih = jax.random.uniform(ks[2], (4 * hidden_size,), jnp.float32, -bound, bound)
    b_hh = jax.random.uniform(ks[3], (4 * hidden_size,), jnp.float32, -bound, bound)
    w_lin = jax.random.uniform(ks[4], (out_size, hidden_size), jnp.float32, -bound, bound)
    b_lin = jax.random.uniform(ks[5], (out_size,), jnp.float32, -bound, bound)

    x = jax.random.normal(ks[6], (batch, seq_len, in_size), jnp.float32)

    y = subnet_forward(x, w_ih, w_hh, b_ih, b_hh, w_lin, b_lin)
    y = jax.block_until_ready(y)

    y_ref = _reference_forward(x, w_ih, w_hh, b_ih, b_hh, w_lin, b_lin)
    assert y.shape == (batch, seq_len, out_size)
    assert jnp.allclose(y, y_ref, atol=1e-4, rtol=1e-4), "mismatch vs. JAX reference"

    print("KERNEL_OK")
</pallas_src>

<mosaic_0001>
module attributes {stable_mosaic.version = 11 : i64} {
  func.func @_subnet_kernel(%arg0: memref<64x16xf32, #tpu.memory_space<vmem>>, %arg1: memref<16x128xf32, #tpu.memory_space<vmem>>, %arg2: memref<32x128xf32, #tpu.memory_space<vmem>>, %arg3: memref<1x128xf32, #tpu.memory_space<vmem>>, %arg4: memref<32x128xf32, #tpu.memory_space<vmem>>, %arg5: memref<1x128xf32, #tpu.memory_space<vmem>>, %arg6: memref<64x128xf32, #tpu.memory_space<vmem>>) attributes {dimension_semantics = [], scalar_prefetch = 0 : i64, scratch_operands = 0 : i64, tpu.core_type = #tpu.core_type<tc>} {
    %c0 = arith.constant 0 : index
    %c0_0 = arith.constant 0 : index
    %0 = vector.load %arg0[%c0, %c0_0] : memref<64x16xf32, #tpu.memory_space<vmem>>, vector<64x16xf32>
    %c0_1 = arith.constant 0 : index
    %c0_2 = arith.constant 0 : index
    %1 = vector.load %arg1[%c0_1, %c0_2] : memref<16x128xf32, #tpu.memory_space<vmem>>, vector<16x128xf32>
    %cst = arith.constant dense<0.000000e+00> : vector<64x128xf32>
    %2 = tpu.matmul %0, %1, %cst {dimension_numbers = #tpu.dot_dimension_numbers<[1], [0], [0], [1], [0, 0, 1, 1], [], []>} : vector<64x16xf32>, vector<16x128xf32>, vector<64x128xf32> -> vector<64x128xf32>
    %c0_3 = arith.constant 0 : index
    %c0_4 = arith.constant 0 : index
    %3 = vector.load %arg3[%c0_3, %c0_4] : memref<1x128xf32, #tpu.memory_space<vmem>>, vector<1x128xf32>
    %4 = vector.broadcast %3 : vector<1x128xf32> to vector<64x128xf32>
    %5 = arith.addf %2, %4 : vector<64x128xf32>
    %c0_5 = arith.constant 0 : index
    %c0_6 = arith.constant 0 : index
    %6 = vector.load %arg2[%c0_5, %c0_6] : memref<32x128xf32, #tpu.memory_space<vmem>>, vector<32x128xf32>
    %cst_7 = arith.constant 0.000000e+00 : f32
    %7 = vector.broadcast %cst_7 : f32 to vector<8x32xf32>
    %cst_8 = arith.constant 0.000000e+00 : f32
    %8 = vector.broadcast %cst_8 : f32 to vector<8x32xf32>
    %9 = vector.extract_strided_slice %5 {offsets = [0, 0], sizes = [8, 128], strides = [1, 1]} : vector<64x128xf32> to vector<8x128xf32>
    %cst_9 = arith.constant dense<0.000000e+00> : vector<8x128xf32>
    %10 = tpu.matmul %7, %6, %cst_9 {dimension_numbers = #tpu.dot_dimension_numbers<[1], [0], [0], [1], [0, 0, 1, 1], [], []>} : vector<8x32xf32>, vector<32x128xf32>, vector<8x128xf32> -> vector<8x128xf32>
    %11 = arith.addf %9, %10 : vector<8x128xf32>
    %12 = arith.negf %11 : vector<8x128xf32>
    %13 = math.exp %12 : vector<8x128xf32>
    %cst_10 = arith.constant 1.000000e+00 : f32
    %14 = vector.broadcast %cst_10 : f32 to vector<8x128xf32>
    %15 = arith.addf %14, %13 : vector<8x128xf32>
    %16 = arith.divf %14, %15 : vector<8x128xf32>
    %17 = vector.extract_strided_slice %11 {offsets = [0, 64], sizes = [8, 32], strides = [1, 1]} : vector<8x128xf32> to vector<8x32xf32>
    %18 = math.tanh %17 : vector<8x32xf32>
    %19 = vector.extract_strided_slice %16 {offsets = [0, 0], sizes = [8, 32], strides = [1, 1]} : vector<8x128xf32> to vector<8x32xf32>
    %20 = vector.extract_strided_slice %16 {offsets = [0, 32], sizes = [8, 32], strides = [1, 1]} : vector<8x128xf32> to vector<8x32xf32>
    %21 = vector.extract_strided_slice %16 {offsets = [0, 96], sizes = [8, 32], strides = [1, 1]} : vector<8x128xf32> to vector<8x32xf32>
    %22 = arith.mulf %20, %8 : vector<8x32xf32>
    %23 = arith.mulf %19, %18 : vector<8x32xf32>
    %24 = arith.addf %22, %23 : vector<8x32xf32>
    %25 = math.tanh %24 : vector<8x32xf32>
    %26 = arith.mulf %21, %25 : vector<8x32xf32>
    %27 = vector.extract_strided_slice %5 {offsets = [8, 0], sizes = [8, 128], strides = [1, 1]} : vector<64x128xf32> to vector<8x128xf32>
    %cst_11 = arith.constant dense<0.000000e+00> : vector<8x128xf32>
    %28 = tpu.matmul %26, %6, %cst_11 {dimension_numbers = #tpu.dot_dimension_numbers<[1], [0], [0], [1], [0, 0, 1, 1], [], []>} : vector<8x32xf32>, vector<32x128xf32>, vector<8x128xf32> -> vector<8x128xf32>
    %29 = arith.addf %27, %28 : vector<8x128xf32>
    %30 = arith.negf %29 : vector<8x128xf32>
    %31 = math.exp %30 : vector<8x128xf32>
    %cst_12 = arith.constant 1.000000e+00 : f32
    %32 = vector.broadcast %cst_12 : f32 to vector<8x128xf32>
    %33 = arith.addf %32, %31 : vector<8x128xf32>
    %34 = arith.divf %32, %33 : vector<8x128xf32>
    %35 = vector.extract_strided_slice %29 {offsets = [0, 64], sizes = [8, 32], strides = [1, 1]} : vector<8x128xf32> to vector<8x32xf32>
    %36 = math.tanh %35 : vector<8x32xf32>
    %37 = vector.extract_strided_slice %34 {offsets = [0, 0], sizes = [8, 32], strides = [1, 1]} : vector<8x128xf32> to vector<8x32xf32>
    %38 = vector.extract_strided_slice %34 {offsets = [0, 32], sizes = [8, 32], strides = [1, 1]} : vector<8x128xf32> to vector<8x32xf32>
    %39 = vector.extract_strided_slice %34 {offsets = [0, 96], sizes = [8, 32], strides = [1, 1]} : vector<8x128xf32> to vector<8x32xf32>
    %40 = arith.mulf %38, %24 : vector<8x32xf32>
    %41 = arith.mulf %37, %36 : vector<8x32xf32>
    %42 = arith.addf %40, %41 : vector<8x32xf32>
    %43 = math.tanh %42 : vector<8x32xf32>
    %44 = arith.mulf %39, %43 : vector<8x32xf32>
    %45 = vector.extract_strided_slice %5 {offsets = [16, 0], sizes = [8, 128], strides = [1, 1]} : vector<64x128xf32> to vector<8x128xf32>
    %cst_13 = arith.constant dense<0.000000e+00> : vector<8x128xf32>
    %46 = tpu.matmul %44, %6, %cst_13 {dimension_numbers = #tpu.dot_dimension_numbers<[1], [0], [0], [1], [0, 0, 1, 1], [], []>} : vector<8x32xf32>, vector<32x128xf32>, vector<8x128xf32> -> vector<8x128xf32>
    %47 = arith.addf %45, %46 : vector<8x128xf32>
    %48 = arith.negf %47 : vector<8x128xf32>
    %49 = math.exp %48 : vector<8x128xf32>
    %cst_14 = arith.constant 1.000000e+00 : f32
    %50 = vector.broadcast %cst_14 : f32 to vector<8x128xf32>
    %51 = arith.addf %50, %49 : vector<8x128xf32>
    %52 = arith.divf %50, %51 : vector<8x128xf32>
    %53 = vector.extract_strided_slice %47 {offsets = [0, 64], sizes = [8, 32], strides = [1, 1]} : vector<8x128xf32> to vector<8x32xf32>
    %54 = math.tanh %53 : vector<8x32xf32>
    %55 = vector.extract_strided_slice %52 {offsets = [0, 0], sizes = [8, 32], strides = [1, 1]} : vector<8x128xf32> to vector<8x32xf32>
    %56 = vector.extract_strided_slice %52 {offsets = [0, 32], sizes = [8, 32], strides = [1, 1]} : vector<8x128xf32> to vector<8x32xf32>
    %57 = vector.extract_strided_slice %52 {offsets = [0, 96], sizes = [8, 32], strides = [1, 1]} : vector<8x128xf32> to vector<8x32xf32>
    %58 = arith.mulf %56, %42 : vector<8x32xf32>
    %59 = arith.mulf %55, %54 : vector<8x32xf32>
    %60 = arith.addf %58, %59 : vector<8x32xf32>
    %61 = math.tanh %60 : vector<8x32xf32>
    %62 = arith.mulf %57, %61 : vector<8x32xf32>
    %63 = vector.extract_strided_slice %5 {offsets = [24, 0], sizes = [8, 128], strides = [1, 1]} : vector<64x128xf32> to vector<8x128xf32>
    %cst_15 = arith.constant dense<0.000000e+00> : vector<8x128xf32>
    %64 = tpu.matmul %62, %6, %cst_15 {dimension_numbers = #tpu.dot_dimension_numbers<[1], [0], [0], [1], [0, 0, 1, 1], [], []>} : vector<8x32xf32>, vector<32x128xf32>, vector<8x128xf32> -> vector<8x128xf32>
    %65 = arith.addf %63, %64 : vector<8x128xf32>
    %66 = arith.negf %65 : vector<8x128xf32>
    %67 = math.exp %66 : vector<8x128xf32>
    %cst_16 = arith.constant 1.000000e+00 : f32
    %68 = vector.broadcast %cst_16 : f32 to vector<8x128xf32>
    %69 = arith.addf %68, %67 : vector<8x128xf32>
    %70 = arith.divf %68, %69 : vector<8x128xf32>
    %71 = vector.extract_strided_slice %65 {offsets = [0, 64], sizes = [8, 32], strides = [1, 1]} : vector<8x128xf32> to vector<8x32xf32>
    %72 = math.tanh %71 : vector<8x32xf32>
    %73 = vector.extract_strided_slice %70 {offsets = [0, 0], sizes = [8, 32], strides = [1, 1]} : vector<8x128xf32> to vector<8x32xf32>
    %74 = vector.extract_strided_slice %70 {offsets = [0, 32], sizes = [8, 32], strides = [1, 1]} : vector<8x128xf32> to vector<8x32xf32>
    %75 = vector.extract_strided_slice %70 {offsets = [0, 96], sizes = [8, 32], strides = [1, 1]} : vector<8x128xf32> to vector<8x32xf32>
    %76 = arith.mulf %74, %60 : vector<8x32xf32>
    %77 = arith.mulf %73, %72 : vector<8x32xf32>
    %78 = arith.addf %76, %77 : vector<8x32xf32>
    %79 = math.tanh %78 : vector<8x32xf32>
    %80 = arith.mulf %75, %79 : vector<8x32xf32>
    %81 = vector.extract_strided_slice %5 {offsets = [32, 0], sizes = [8, 128], strides = [1, 1]} : vector<64x128xf32> to vector<8x128xf32>
    %cst_17 = arith.constant dense<0.000000e+00> : vector<8x128xf32>
    %82 = tpu.matmul %80, %6, %cst_17 {dimension_numbers = #tpu.dot_dimension_numbers<[1], [0], [0], [1], [0, 0, 1, 1], [], []>} : vector<8x32xf32>, vector<32x128xf32>, vector<8x128xf32> -> vector<8x128xf32>
    %83 = arith.addf %81, %82 : vector<8x128xf32>
    %84 = arith.negf %83 : vector<8x128xf32>
    %85 = math.exp %84 : vector<8x128xf32>
    %cst_18 = arith.constant 1.000000e+00 : f32
    %86 = vector.broadcast %cst_18 : f32 to vector<8x128xf32>
    %87 = arith.addf %86, %85 : vector<8x128xf32>
    %88 = arith.divf %86, %87 : vector<8x128xf32>
    %89 = vector.extract_strided_slice %83 {offsets = [0, 64], sizes = [8, 32], strides = [1, 1]} : vector<8x128xf32> to vector<8x32xf32>
    %90 = math.tanh %89 : vector<8x32xf32>
    %91 = vector.extract_strided_slice %88 {offsets = [0, 0], sizes = [8, 32], strides = [1, 1]} : vector<8x128xf32> to vector<8x32xf32>
    %92 = vector.extract_strided_slice %88 {offsets = [0, 32], sizes = [8, 32], strides = [1, 1]} : vector<8x128xf32> to vector<8x32xf32>
    %93 = vector.extract_strided_slice %88 {offsets = [0, 96], sizes = [8, 32], strides = [1, 1]} : vector<8x128xf32> to vector<8x32xf32>
    %94 = arith.mulf %92, %78 : vector<8x32xf32>
    %95 = arith.mulf %91, %90 : vector<8x32xf32>
    %96 = arith.addf %94, %95 : vector<8x32xf32>
    %97 = math.tanh %96 : vector<8x32xf32>
    %98 = arith.mulf %93, %97 : vector<8x32xf32>
    %99 = vector.extract_strided_slice %5 {offsets = [40, 0], sizes = [8, 128], strides = [1, 1]} : vector<64x128xf32> to vector<8x128xf32>
    %cst_19 = arith.constant dense<0.000000e+00> : vector<8x128xf32>
    %100 = tpu.matmul %98, %6, %cst_19 {dimension_numbers = #tpu.dot_dimension_numbers<[1], [0], [0], [1], [0, 0, 1, 1], [], []>} : vector<8x32xf32>, vector<32x128xf32>, vector<8x128xf32> -> vector<8x128xf32>
    %101 = arith.addf %99, %100 : vector<8x128xf32>
    %102 = arith.negf %101 : vector<8x128xf32>
    %103 = math.exp %102 : vector<8x128xf32>
    %cst_20 = arith.constant 1.000000e+00 : f32
    %104 = vector.broadcast %cst_20 : f32 to vector<8x128xf32>
    %105 = arith.addf %104, %103 : vector<8x128xf32>
    %106 = arith.divf %104, %105 : vector<8x128xf32>
    %107 = vector.extract_strided_slice %101 {offsets = [0, 64], sizes = [8, 32], strides = [1, 1]} : vector<8x128xf32> to vector<8x32xf32>
    %108 = math.tanh %107 : vector<8x32xf32>
    %109 = vector.extract_strided_slice %106 {offsets = [0, 0], sizes = [8, 32], strides = [1, 1]} : vector<8x128xf32> to vector<8x32xf32>
    %110 = vector.extract_strided_slice %106 {offsets = [0, 32], sizes = [8, 32], strides = [1, 1]} : vector<8x128xf32> to vector<8x32xf32>
    %111 = vector.extract_strided_slice %106 {offsets = [0, 96], sizes = [8, 32], strides = [1, 1]} : vector<8x128xf32> to vector<8x32xf32>
    %112 = arith.mulf %110, %96 : vector<8x32xf32>
    %113 = arith.mulf %109, %108 : vector<8x32xf32>
    %114 = arith.addf %112, %113 : vector<8x32xf32>
    %115 = math.tanh %114 : vector<8x32xf32>
    %116 = arith.mulf %111, %115 : vector<8x32xf32>
    %117 = vector.extract_strided_slice %5 {offsets = [48, 0], sizes = [8, 128], strides = [1, 1]} : vector<64x128xf32> to vector<8x128xf32>
    %cst_21 = arith.constant dense<0.000000e+00> : vector<8x128xf32>
    %118 = tpu.matmul %116, %6, %cst_21 {dimension_numbers = #tpu.dot_dimension_numbers<[1], [0], [0], [1], [0, 0, 1, 1], [], []>} : vector<8x32xf32>, vector<32x128xf32>, vector<8x128xf32> -> vector<8x128xf32>
    %119 = arith.addf %117, %118 : vector<8x128xf32>
    %120 = arith.negf %119 : vector<8x128xf32>
    %121 = math.exp %120 : vector<8x128xf32>
    %cst_22 = arith.constant 1.000000e+00 : f32
    %122 = vector.broadcast %cst_22 : f32 to vector<8x128xf32>
    %123 = arith.addf %122, %121 : vector<8x128xf32>
    %124 = arith.divf %122, %123 : vector<8x128xf32>
    %125 = vector.extract_strided_slice %119 {offsets = [0, 64], sizes = [8, 32], strides = [1, 1]} : vector<8x128xf32> to vector<8x32xf32>
    %126 = math.tanh %125 : vector<8x32xf32>
    %127 = vector.extract_strided_slice %124 {offsets = [0, 0], sizes = [8, 32], strides = [1, 1]} : vector<8x128xf32> to vector<8x32xf32>
    %128 = vector.extract_strided_slice %124 {offsets = [0, 32], sizes = [8, 32], strides = [1, 1]} : vector<8x128xf32> to vector<8x32xf32>
    %129 = vector.extract_strided_slice %124 {offsets = [0, 96], sizes = [8, 32], strides = [1, 1]} : vector<8x128xf32> to vector<8x32xf32>
    %130 = arith.mulf %128, %114 : vector<8x32xf32>
    %131 = arith.mulf %127, %126 : vector<8x32xf32>
    %132 = arith.addf %130, %131 : vector<8x32xf32>
    %133 = math.tanh %132 : vector<8x32xf32>
    %134 = arith.mulf %129, %133 : vector<8x32xf32>
    %135 = vector.extract_strided_slice %5 {offsets = [56, 0], sizes = [8, 128], strides = [1, 1]} : vector<64x128xf32> to vector<8x128xf32>
    %cst_23 = arith.constant dense<0.000000e+00> : vector<8x128xf32>
    %136 = tpu.matmul %134, %6, %cst_23 {dimension_numbers = #tpu.dot_dimension_numbers<[1], [0], [0], [1], [0, 0, 1, 1], [], []>} : vector<8x32xf32>, vector<32x128xf32>, vector<8x128xf32> -> vector<8x128xf32>
    %137 = arith.addf %135, %136 : vector<8x128xf32>
    %138 = arith.negf %137 : vector<8x128xf32>
    %139 = math.exp %138 : vector<8x128xf32>
    %cst_24 = arith.constant 1.000000e+00 : f32
    %140 = vector.broadcast %cst_24 : f32 to vector<8x128xf32>
    %141 = arith.addf %140, %139 : vector<8x128xf32>
    %142 = arith.divf %140, %141 : vector<8x128xf32>
    %143 = vector.extract_strided_slice %137 {offsets = [0, 64], sizes = [8, 32], strides = [1, 1]} : vector<8x128xf32> to vector<8x32xf32>
    %144 = math.tanh %143 : vector<8x32xf32>
    %145 = vector.extract_strided_slice %142 {offsets = [0, 0], sizes = [8, 32], strides = [1, 1]} : vector<8x128xf32> to vector<8x32xf32>
    %146 = vector.extract_strided_slice %142 {offsets = [0, 32], sizes = [8, 32], strides = [1, 1]} : vector<8x128xf32> to vector<8x32xf32>
    %147 = vector.extract_strided_slice %142 {offsets = [0, 96], sizes = [8, 32], strides = [1, 1]} : vector<8x128xf32> to vector<8x32xf32>
    %148 = arith.mulf %146, %132 : vector<8x32xf32>
    %149 = arith.mulf %145, %144 : vector<8x32xf32>
    %150 = arith.addf %148, %149 : vector<8x32xf32>
    %151 = math.tanh %150 : vector<8x32xf32>
    %152 = arith.mulf %147, %151 : vector<8x32xf32>
    %153 = tpu.concatenate %26, %44, %62, %80, %98, %116, %134, %152 in 0 : vector<8x32xf32>, vector<8x32xf32>, vector<8x32xf32>, vector<8x32xf32>, vector<8x32xf32>, vector<8x32xf32>, vector<8x32xf32>, vector<8x32xf32> -> vector<64x32xf32>
    %c0_25 = arith.constant 0 : index
    %c0_26 = arith.constant 0 : index
    %154 = vector.load %arg4[%c0_25, %c0_26] : memref<32x128xf32, #tpu.memory_space<vmem>>, vector<32x128xf32>
    %cst_27 = arith.constant dense<0.000000e+00> : vector<64x128xf32>
    %155 = tpu.matmul %153, %154, %cst_27 {dimension_numbers = #tpu.dot_dimension_numbers<[1], [0], [0], [1], [0, 0, 1, 1], [], []>} : vector<64x32xf32>, vector<32x128xf32>, vector<64x128xf32> -> vector<64x128xf32>
    %c0_28 = arith.constant 0 : index
    %c0_29 = arith.constant 0 : index
    %156 = vector.load %arg5[%c0_28, %c0_29] : memref<1x128xf32, #tpu.memory_space<vmem>>, vector<1x128xf32>
    %157 = vector.broadcast %156 : vector<1x128xf32> to vector<64x128xf32>
    %158 = arith.addf %155, %157 : vector<64x128xf32>
    %cst_30 = arith.constant 0.000000e+00 : f32
    %159 = vector.broadcast %cst_30 : f32 to vector<64x128xf32>
    %160 = arith.maximumf %158, %159 : vector<64x128xf32>
    %c0_31 = arith.constant 0 : index
    %c0_32 = arith.constant 0 : index
    %161 = vector.load %arg6[%c0_31, %c0_32] : memref<64x128xf32, #tpu.memory_space<vmem>>, vector<64x128xf32>
    tpu.vector_store %arg6[%c0_31, %c0_32], %160 {strides = array<i32>} : memref<64x128xf32, #tpu.memory_space<vmem>>, vector<64x128xf32>,
    return
  }
}

</mosaic_0001>

<bundles_post_ra>
// kernel: subnet_forward.1
= control target key start
LH: loop header
LB: loop body
LE: loop exit
PB: predicated region body
PF: predicated region fallthrough
CT: control target
= control target key end

     0   :  { %vm40_vm0 = vcmask 130048   ;;  %v1464_v10 = vmov 0.0|0.0   ;;  %vm1465_vm1 = vmmov 0   ;;  %v1466_v16 = vmov 0.0   ;;  %s1467_s21 = smov 64   ;;  %s1748_s1 = inlined_call_operand.vmem [shape: f32[16,128], index: 1, kind: input, shape index: {}]   ;;  %s1749_s0 = inlined_call_operand.vmem [shape: f32[64,16], index: 0, kind: input, shape index: {}]   ;;  %s1750_s2 = inlined_call_operand.vmem [shape: f32[32,128], index: 2, kind: input, shape index: {}]   ;;  %s1751_s3 = inlined_call_operand.vmem [shape: f32[1,128], index: 3, kind: input, shape index: {}]   ;;  %s1752_s4 = inlined_call_operand.vmem [shape: f32[32,128], index: 4, kind: input, shape index: {}]   ;;  %s1753_s5 = inlined_call_operand.vmem [shape: f32[1,128], index: 5, kind: input, shape index: {}]   ;;  %s1754_s6 = inlined_call_operand.vmem [shape: f32[64,128], index: 6, kind: output, shape index: {}]  }
   0x1   :  { %v31_v0 = vld [vmem:[%s1748_s1] sm:$0xff]  ;;  %v32_v1 = vld [vmem:[%s1748_s1 + $0x8] sm:$0xff]  ;;  %v29_v11 = vld [vmem:[%s1749_s0 + $0x30] sm:$0xff]  ;;  %vm174_vm2 = vcmask 261120  }
   0x2   :  { %v27_v2 = vld [vmem:[%s1749_s0 + $0x20] sm:$0xff]  ;;  %v1333_v3 = vpack.c.bf16 %v32_v1, %v31_v0  ;;  %v171_v5 = vld [vmem:[%s1750_s2 + $0x8] sm:$0xff]  ;;  %v172_v12 = vld [vmem:[%s1750_s2 + $0x10] sm:$0xff] }
   0x3   :  { %1219 = vmatprep.mubr.msk.f32.mxu1 %vm40_vm0, %v27_v2  ;;  %v170_v4 = vld [vmem:[%s1750_s2] sm:$0xff]  ;;  %v28_v7 = vld [vmem:[%s1749_s0 + $0x28] sm:$0xff]  ;;  %v173_v13 = vld [vmem:[%s1750_s2 + $0x18] sm:$0xff] }
   0x4   :  { %v23_v6 = vld [vmem:[%s1749_s0] sm:$0xff]  ;;  %1393 = vmatprep.subr.bf16.mxu1 %v1333_v3  ;;  %1334 = vmatprep.subr.bf16.mxu0 %v1333_v3  ;;  %v1526_v8 = vpack.c.bf16 %v171_v5, %v170_v4  ;;  %v24_v9 = vld [vmem:[%s1749_s0 + $0x8] sm:$0xff]  ;;  %v30_v14 = vld [vmem:[%s1749_s0 + $0x38] sm:$0xff]  ;;  %v1550_v15 = vpack.c.bf16 %v173_v13, %v172_v12 }
   0x5   :  { %1394 = vmatpush3.bf16.msra.mxu1 %v1333_v3  ;;  %1336 = vmatpush3.bf16.msra.mxu0 %v1333_v3  ;;  %v1576_v21 = vld [vmem:[%s1751_s3] ss:$0 sm:$0xff]  ;;  %s1468_s3 = smov 32   ;;  %v25_v56 = vld [vmem:[%s1749_s0 + $0x10] sm:$0xff]  ;;  %v26_v57 = vld [vmem:[%s1749_s0 + $0x18] sm:$0xff] }
   0x6   :  { %1337 = vmatprep.subr.bf16.mxu1 %v1464_v10  ;;  %1213 = vmatprep.mubr.msk.f32.mxu0 %vm40_vm0, %v23_v6 }
   0x7   :  { %1349 = vmatprep.subr.bf16.mxu0 %v1464_v10 }
   0x8   :  { %1220 = vmatmul.mubr.msk.f32.vlgmr.msra.gmra.mrb[0].mxu1 %vm40_vm0, %v28_v7  ;;  %1214 = vmatmul.mubr.msk.f32.vlgmr.msra.gmra.mrb[0].mxu0 %vm40_vm0, %v24_v9 }
   0x9   :  { %1339 = vmatpush3.bf16.msra.mxu1 %v1526_v8  ;;  %1222 = vmatprep.mubr.msk.f32.mxu1 %vm40_vm0, %v29_v11 }
   0xa   :  { %1340 = vmatprep.subr.bf16.mxu1 %v1464_v10  ;;  %1351 = vmatpush3.bf16.msra.mxu0 %v1526_v8 }
   0xb   :  { %1352 = vmatprep.subr.bf16.mxu0 %v1464_v10  ;;  %1216 = vmatprep.mubr.msk.f32.mxu0 %vm40_vm0, %v25_v56 }
   0xc   :  { %1223 = vmatmul.mubr.msk.f32.gmra.mrb[2].mxu1 %vm40_vm0, %v30_v14  ;;  %1217 = vmatmul.mubr.msk.f32.gmra.mrb[2].mxu0 %vm40_vm0, %v26_v57 }
   0xd   :  { %1342 = vmatpush3.bf16.msra.mxu1 %v1550_v15  ;;  %1233 = vmatprep.mubr.msk.f32.mxu1 %vm1465_vm1, %v1466_v16 }
   0xe   :  { %1343 = vmatprep.subr.bf16.mxu1 %v1464_v10  ;;  %1354 = vmatpush3.bf16.msra.mxu0 %v1550_v15 }
   0xf   :  { %1361 = vmatprep.subr.bf16.mxu0 %v1464_v10  ;;  %1255 = vmatprep.mubr.msk.f32.mxu0 %vm1465_vm1, %v1466_v16 }
  0x10   :  { %1234 = vmatmul.mubr.f32.vlgmr.msra.gmra.mrb[4].mxu1 %v1466_v16 }
  0x11   :  { %1345 = vmatpush3.bf16.msra.mxu1 %v1526_v8  ;;  %1244 = vmatprep.mubr.msk.f32.mxu1 %vm1465_vm1, %v1466_v16 }
  0x12   :  { %1346 = vmatprep.subr.bf16.mxu1 %v1464_v10 }
  0x15   :  { %1348 = vmatpush3.bf16.msra.mxu1 %v1550_v15 }
  0x16   :  { %1355 = vmatprep.subr.bf16.mxu1 %v1464_v10 }
  0xdb   :  { %v1569_v17 = vpop.f32.mrb[0].mxu1  ;;  %v1215_v18 = vpop.f32.mrb[0].mxu0 }
  0xdc   :  { %v1571_v19 = vpop.f32.mrb[1].mxu1  ;;  %v131_v20 = vpop.f32.mrb[1].mxu0  ;;  %v137_v42 = vadd.f32 %v1215_v18, %v1576_v21 }
  0xdd   :  { %v132_v24 = vadd.f32 %v1576_v21, %v131_v20 }
  0xdf   :  { %v1578_v22 = vpop.f32.mrb[2].mxu1  ;;  %v1218_v61 = vpop.f32.mrb[2].mxu0 }
  0xe0   :  { %v1580_v23 = vpop.f32.mrb[3].mxu1  ;;  %v141_v62 = vpop.f32.mrb[3].mxu0 }
  0xe1   :  { %v142_v0 = vadd.f32 %v1576_v21, %v141_v62 }
  0xe3   :  { %v244_v25 = vpop.f32.mrb[4].mxu1 }
  0xe4   :  { %v248_v26 = vadd.f32 %v244_v25, %v132_v24  ;;  %v1235_v27 = vpop.f32.mrb[5].mxu1 }
  0xe5   :  { %v147_v27 = vadd.f32 %v1218_v61, %v1576_v21 }
  0xe6   :  { %1400 = vtanh.f32 %v248_v26  ;;  %v1123_v29 = vmul.f32 -1.442695, %v248_v26 }
  0xe8   :  { %1402 = vpow2.f32 %v1123_v29 }
  0xf0   :  { %v1401_v28 = vpop.eup %1400 }
  0xf1   :  { %258 = vrot.lane.b32.xlu0 %v1401_v28, %s1467_s21 }
  0xf2   :  { %v1403_v30 = vpop.eup %1402 }
  0xf3   :  { %v252_v31 = vadd.f32 1.0, %v1403_v30 }
  0xf5   :  { %1404 = vrcp.f32 %v252_v31 }
  0xff   :  { %v1405_v32 = vpop.eup %1404 }
 0x100   :  { %v256_v35 = vmul.f32 0.0, %v1405_v32 }
 0x163   :  { %v259_v33 = vpop.permute.xlu0 %258 }
 0x164   :  { %v261_v34 = vmul.f32 %v1405_v32, %v259_v33 }
 0x166   :  { %263 = vrot.lane.b32.xlu0 %v261_v34, %s1468_s3 }
 0x1d8   :  { %v264_v36 = vpop.permute.xlu0 %263 }
 0x1d9   :  { %v266_v37 = vadd.f32 %v264_v36, %v256_v35 }
 0x1db   :  { %1406 = vtanh.f32 %v266_v37 }
 0x1e5   :  { %v1407_v38 = vpop.eup %1406 }
 0x1e6   :  { %269 = vrot.lane.b32.xlu1 %v1407_v38, %s1467_s21 }
 0x258   :  { %v270_v39 = vpop.permute.xlu1 %269 }
 0x259   :  { %v272_v40 = vmul.f32 %v1405_v32, %v270_v39 }
 0x25b   :  { %274 = vrot.lane.b32.xlu1 %v272_v40, %s1468_s3 }
 0x2cd   :  { %v1587_v41 = vpop.permute.xlu1 %274 }
 0x2ce   :  { %1245 = vmatmul.mubr.msk.f32.vlgmr.msra.gmra.mrb[6].mxu1 %vm174_vm2, %v1587_v41 }
 0x2cf   :  { %1357 = vmatpush3.bf16.msra.mxu1 %v1526_v8  ;;  %1266 = vmatprep.mubr.msk.f32.mxu1 %vm1465_vm1, %v1466_v16 }
 0x2d0   :  { %1358 = vmatprep.subr.bf16.mxu1 %v1464_v10 }
 0x2d3   :  { %1360 = vmatpush3.bf16.msra.mxu1 %v1550_v15 }
 0x2d4   :  { %1367 = vmatprep.subr.bf16.mxu1 %v1464_v10 }
 0x3a1   :  { %v344_v43 = vpop.f32.mrb[6].mxu1 }
 0x3a2   :  { %v348_v44 = vadd.f32 %v344_v43, %v137_v42  ;;  %v1246_v45 = vpop.f32.mrb[7].mxu1 }
 0x3a4   :  { %1408 = vtanh.f32 %v348_v44  ;;  %v1125_v47 = vmul.f32 -1.442695, %v348_v44 }
 0x3a6   :  { %1410 = vpow2.f32 %v1125_v47 }
 0x3ae   :  { %v1409_v46 = vpop.eup %1408 }
 0x3af   :  { %358 = vrot.lane.b32.xlu0 %v1409_v46, %s1467_s21  ;;  %v152_v46 = vadd.f32 %v1576_v21, %v1571_v19 }
 0x3b0   :  { %v1411_v48 = vpop.eup %1410 }
 0x3b1   :  { %v352_v49 = vadd.f32 1.0, %v1411_v48 }
 0x3b3   :  { %1412 = vrcp.f32 %v352_v49 }
 0x3bd   :  { %v1413_v50 = vpop.eup %1412 }
 0x3be   :  { %v356_v53 = vmul.f32 %v1413_v50, %v266_v37 }
 0x421   :  { %v359_v51 = vpop.permute.xlu0 %358 }
 0x422   :  { %v361_v52 = vmul.f32 %v1413_v50, %v359_v51 }
 0x424   :  { %363 = vrot.lane.b32.xlu1 %v361_v52, %s1468_s3 }
 0x496   :  { %v364_v54 = vpop.permute.xlu1 %363 }
 0x497   :  { %v366_v55 = vadd.f32 %v364_v54, %v356_v53 }
 0x499   :  { %1414 = vtanh.f32 %v366_v55 }
 0x4a3   :  { %v1415_v58 = vpop.eup %1414 }
 0x4a4   :  { %369 = vrot.lane.b32.xlu0 %v1415_v58, %s1467_s21 }
 0x516   :  { %v370_v59 = vpop.permute.xlu0 %369 }
 0x517   :  { %v372_v60 = vmul.f32 %v1413_v50, %v370_v59 }
 0x519   :  { %374 = vrot.lane.b32.xlu1 %v372_v60, %s1468_s3 }
 0x58b   :  { %v1612_v63 = vpop.permute.xlu1 %374 }
 0x58c   :  { %1256 = vmatmul.mubr.msk.f32.vlgmr.msra.gmra.mrb[4].mxu0 %vm174_vm2, %v1612_v63 }
 0x58d   :  { %1363 = vmatpush3.bf16.msra.mxu0 %v1526_v8  ;;  %1277 = vmatprep.mubr.msk.f32.mxu0 %vm1465_vm1, %v1466_v16 }
 0x58e   :  { %1364 = vmatprep.subr.bf16.mxu0 %v1464_v10 }
 0x591   :  { %1366 = vmatpush3.bf16.msra.mxu0 %v1550_v15 }
 0x592   :  { %1373 = vmatprep.subr.bf16.mxu0 %v1464_v10 }
 0x65f   :  { %v444_v1 = vpop.f32.mrb[4].mxu0 }
 0x660   :  { %v448_v2 = vadd.f32 %v444_v1, %v142_v0  ;;  %v1257_v3 = vpop.f32.mrb[5].mxu0  ;;  %v157_v0 = vadd.f32 %v1569_v17, %v1576_v21 }
 0x662   :  { %1416 = vtanh.f32 %v448_v2  ;;  %v1127_v5 = vmul.f32 -1.442695, %v448_v2 }
 0x664   :  { %1418 = vpow2.f32 %v1127_v5 }
 0x66c   :  { %v1417_v4 = vpop.eup %1416 }
 0x66d   :  { %458 = vrot.lane.b32.xlu0 %v1417_v4, %s1467_s21 }
 0x66e   :  { %v1419_v6 = vpop.eup %1418 }
 0x66f   :  { %v452_v7 = vadd.f32 1.0, %v1419_v6 }
 0x671   :  { %1420 = vrcp.f32 %v452_v7 }
 0x67b   :  { %v1421_v9 = vpop.eup %1420 }
 0x67c   :  { %v456_v13 = vmul.f32 %v1421_v9, %v366_v55 }
 0x6df   :  { %v459_v11 = vpop.permute.xlu0 %458 }
 0x6e0   :  { %v461_v12 = vmul.f32 %v1421_v9, %v459_v11  ;;  %v973_v11 = vld [vmem:[%s1752_s4] sm:$0xff] }
 0x6e2   :  { %463 = vrot.lane.b32.xlu1 %v461_v12, %s1468_s3  ;;  %v974_v12 = vld [vmem:[%s1752_s4 + $0x8] sm:$0xff] }
 0x754   :  { %v464_v14 = vpop.permute.xlu1 %463 }
 0x755   :  { %v466_v18 = vadd.f32 %v464_v14, %v456_v13  ;;  %v1385_v13 = vpack.c.bf16 %v974_v12, %v973_v11 }
 0x757   :  { %1422 = vtanh.f32 %v466_v18 }
 0x761   :  { %v1423_v20 = vpop.eup %1422 }
 0x762   :  { %469 = vrot.lane.b32.xlu0 %v1423_v20, %s1467_s21 }
 0x7d4   :  { %v470_v24 = vpop.permute.xlu0 %469 }
 0x7d5   :  { %v472_v25 = vmul.f32 %v1421_v9, %v470_v24  ;;  %v975_v24 = vld [vmem:[%s1752_s4 + $0x10] sm:$0xff] }
 0x7d7   :  { %474 = vrot.lane.b32.xlu1 %v472_v25, %s1468_s3  ;;  %v976_v25 = vld [vmem:[%s1752_s4 + $0x18] sm:$0xff] }
 0x849   :  { %v1627_v26 = vpop.permute.xlu1 %474 }
 0x84a   :  { %1267 = vmatmul.mubr.msk.f32.vlgmr.msra.gmra.mrb[8].mxu1 %vm174_vm2, %v1627_v26 }
 0x84b   :  { %1369 = vmatpush3.bf16.msra.mxu1 %v1526_v8  ;;  %1288 = vmatprep.mubr.msk.f32.mxu1 %vm1465_vm1, %v1466_v16 }
 0x84c   :  { %1370 = vmatprep.subr.bf16.mxu1 %v1464_v10 }
 0x84f   :  { %1372 = vmatpush3.bf16.msra.mxu1 %v1550_v15 }
 0x850   :  { %1379 = vmatprep.subr.bf16.mxu1 %v1464_v10 }
 0x91d   :  { %v544_v28 = vpop.f32.mrb[8].mxu1 }
 0x91e   :  { %v548_v29 = vadd.f32 %v544_v28, %v147_v27  ;;  %v1268_v30 = vpop.f32.mrb[9].mxu1  ;;  %v1389_v27 = vpack.c.bf16 %v976_v25, %v975_v24 }
 0x920   :  { %1424 = vtanh.f32 %v548_v29  ;;  %v1129_v32 = vmul.f32 -1.442695, %v548_v29  ;;  %v162_v29 = vadd.f32 %v1576_v21, %v1580_v23 }
 0x922   :  { %1426 = vpow2.f32 %v1129_v32 }
 0x92a   :  { %v1425_v31 = vpop.eup %1424 }
 0x92b   :  { %558 = vrot.lane.b32.xlu0 %v1425_v31, %s1467_s21 }
 0x92c   :  { %v1427_v33 = vpop.eup %1426 }
 0x92d   :  { %v552_v34 = vadd.f32 1.0, %v1427_v33 }
 0x92f   :  { %1428 = vrcp.f32 %v552_v34 }
 0x939   :  { %v1429_v35 = vpop.eup %1428 }
 0x93a   :  { %v556_v38 = vmul.f32 %v1429_v35, %v466_v18 }
 0x99d   :  { %v559_v36 = vpop.permute.xlu0 %558 }
 0x99e   :  { %v561_v37 = vmul.f32 %v1429_v35, %v559_v36 }
 0x9a0   :  { %563 = vrot.lane.b32.xlu1 %v561_v37, %s1468_s3 }
 0xa12   :  { %v564_v39 = vpop.permute.xlu1 %563 }
 0xa13   :  { %v566_v40 = vadd.f32 %v564_v39, %v556_v38 }
 0xa15   :  { %1430 = vtanh.f32 %v566_v40 }
 0xa1f   :  { %v1431_v42 = vpop.eup %1430 }
 0xa20   :  { %569 = vrot.lane.b32.xlu0 %v1431_v42, %s1467_s21 }
 0xa92   :  { %v570_v43 = vpop.permute.xlu0 %569 }
 0xa93   :  { %v572_v44 = vmul.f32 %v1429_v35, %v570_v43 }
 0xa95   :  { %574 = vrot.lane.b32.xlu1 %v572_v44, %s1468_s3 }
 0xb07   :  { %v1642_v45 = vpop.permute.xlu1 %574 }
 0xb08   :  { %1278 = vmatmul.mubr.msk.f32.vlgmr.msra.gmra.mrb[6].mxu0 %vm174_vm2, %v1642_v45 }
 0xb09   :  { %1375 = vmatpush3.bf16.msra.mxu0 %v1526_v8  ;;  %1299 = vmatprep.mubr.msk.f32.mxu0 %vm1465_vm1, %v1466_v16 }
 0xb0a   :  { %1376 = vmatprep.subr.bf16.mxu0 %v1464_v10 }
 0xb0d   :  { %1378 = vmatpush3.bf16.msra.mxu0 %v1550_v15 }
 0xb0e   :  { %1386 = vmatprep.subr.bf16.mxu0 %v1385_v13 }
 0xbdb   :  { %v644_v47 = vpop.f32.mrb[6].mxu0 }
 0xbdc   :  { %v648_v48 = vadd.f32 %v644_v47, %v152_v46  ;;  %v1279_v49 = vpop.f32.mrb[7].mxu0 }
 0xbde   :  { %1432 = vtanh.f32 %v648_v48  ;;  %v1131_v51 = vmul.f32 -1.442695, %v648_v48 }
 0xbe0   :  { %1434 = vpow2.f32 %v1131_v51 }
 0xbe8   :  { %v1433_v50 = vpop.eup %1432 }
 0xbe9   :  { %658 = vrot.lane.b32.xlu0 %v1433_v50, %s1467_s21 }
 0xbea   :  { %v1435_v52 = vpop.eup %1434 }
 0xbeb   :  { %v652_v53 = vadd.f32 1.0, %v1435_v52 }
 0xbed   :  { %1436 = vrcp.f32 %v652_v53 }
 0xbf7   :  { %v1437_v54 = vpop.eup %1436 }
 0xbf8   :  { %v656_v57 = vmul.f32 %v1437_v54, %v566_v40 }
 0xc5b   :  { %v659_v55 = vpop.permute.xlu0 %658 }
 0xc5c   :  { %v661_v56 = vmul.f32 %v1437_v54, %v659_v55 }
 0xc5e   :  { %663 = vrot.lane.b32.xlu1 %v661_v56, %s1468_s3 }
 0xcd0   :  { %v664_v58 = vpop.permute.xlu1 %663 }
 0xcd1   :  { %v666_v19 = vadd.f32 %v664_v58, %v656_v57 }
 0xcd3   :  { %1438 = vtanh.f32 %v666_v19 }
 0xcdd   :  { %v1439_v59 = vpop.eup %1438 }
 0xcde   :  { %669 = vrot.lane.b32.xlu0 %v1439_v59, %s1467_s21 }
 0xd50   :  { %v670_v60 = vpop.permute.xlu0 %669 }
 0xd51   :  { %v672_v61 = vmul.f32 %v1437_v54, %v670_v60 }
 0xd53   :  { %674 = vrot.lane.b32.xlu1 %v672_v61, %s1468_s3 }
 0xdc5   :  { %v675_v62 = vpop.permute.xlu1 %674 }
 0xdc6   :  { %1289 = vmatmul.mubr.msk.f32.vlgmr.msra.gmra.mrb[10].mxu1 %vm174_vm2, %v675_v62 }
 0xdc7   :  { %1381 = vmatpush3.bf16.msra.mxu1 %v1526_v8  ;;  %1310 = vmatprep.mubr.msk.f32.mxu1 %vm1465_vm1, %v1466_v16 }
 0xdc8   :  { %1382 = vmatprep.subr.bf16.mxu1 %v1464_v10 }
 0xdcb   :  { %1384 = vmatpush3.bf16.msra.mxu1 %v1550_v15 }
 0xe99   :  { %v744_v1 = vpop.f32.mrb[10].mxu1 }
 0xe9a   :  { %v748_v2 = vadd.f32 %v744_v1, %v157_v0  ;;  %v1290_v3 = vpop.f32.mrb[11].mxu1 }
 0xe9c   :  { %1440 = vtanh.f32 %v748_v2  ;;  %v1133_v5 = vmul.f32 -1.442695, %v748_v2 }
 0xe9e   :  { %1442 = vpow2.f32 %v1133_v5 }
 0xea6   :  { %v1441_v4 = vpop.eup %1440 }
 0xea7   :  { %758 = vrot.lane.b32.xlu0 %v1441_v4, %s1467_s21 }
 0xea8   :  { %v1443_v8 = vpop.eup %1442 }
 0xea9   :  { %v752_v6 = vadd.f32 1.0, %v1443_v8 }
 0xeab   :  { %1444 = vrcp.f32 %v752_v6 }
 0xeb5   :  { %v1445_v16 = vpop.eup %1444 }
 0xeb6   :  { %v756_v15 = vmul.f32 %v1445_v16, %v666_v19 }
 0xf19   :  { %v759_v7 = vpop.permute.xlu0 %758 }
 0xf1a   :  { %v761_v10 = vmul.f32 %v1445_v16, %v759_v7 }
 0xf1c   :  { %763 = vrot.lane.b32.xlu1 %v761_v10, %s1468_s3 }
 0xf8e   :  { %v764_v9 = vpop.permute.xlu1 %763 }
 0xf8f   :  { %v1667_v17 = vadd.f32 %v764_v9, %v756_v15 }
 0xf91   :  { %1446 = vtanh.f32 %v1667_v17 }
 0xf9b   :  { %v1447_v14 = vpop.eup %1446 }
 0xf9c   :  { %769 = vrot.lane.b32.xlu0 %v1447_v14, %s1467_s21 }
0x100e   :  { %v770_v18 = vpop.permute.xlu0 %769 }
0x100f   :  { %v772_v20 = vmul.f32 %v1445_v16, %v770_v18 }
0x1011   :  { %774 = vrot.lane.b32.xlu1 %v772_v20, %s1468_s3 }
0x1083   :  { %v775_v28 = vpop.permute.xlu1 %774 }
0x1084   :  { %1300 = vmatmul.mubr.msk.f32.vlgmr.msra.gmra.mrb[8].mxu0 %vm174_vm2, %v775_v28 }
0x1085   :  { %1388 = vmatpush3.bf16.msra.mxu0 %v1385_v13  ;;  %1321 = vmatprep.mubr.msk.f32.mxu0 %vm174_vm2, %v1587_v41 }
0x1086   :  { %1390 = vmatprep.subr.bf16.mxu0 %v1389_v27 }
0x1089   :  { %1392 = vmatpush3.bf16.msra.mxu0 %v1389_v27 }
0x108c   :  { %1322 = vmatmul.mubr.msk.f32.vlgmr.msra.gmra.mrb[10].mxu0 %vm174_vm2, %v1612_v63  ;;  %v1700_v63 = vld [vmem:[%s1753_s5] ss:$0 sm:$0xff] }
0x108d   :  { %1324 = vmatprep.mubr.msk.f32.mxu0 %vm174_vm2, %v1627_v26 }
0x1090   :  { %1325 = vmatmul.mubr.msk.f32.gmra.mrb[12].mxu0 %vm174_vm2, %v1642_v45 }
0x1091   :  { %1327 = vmatprep.mubr.msk.f32.mxu0 %vm174_vm2, %v675_v62  ;;  %v167_v62 = vadd.f32 %v1578_v22, %v1576_v21 }
0x1094   :  { %1328 = vmatmul.mubr.msk.f32.gmra.mrb[14].mxu0 %vm174_vm2, %v775_v28 }
0x1157   :  { %v844_v30 = vpop.f32.mrb[8].mxu0 }
0x1158   :  { %v848_v41 = vadd.f32 %v844_v30, %v162_v29  ;;  %v1301_v31 = vpop.f32.mrb[9].mxu0 }
0x115a   :  { %1448 = vtanh.f32 %v848_v41  ;;  %v1135_v50 = vmul.f32 -1.442695, %v848_v41 }
0x115c   :  { %1450 = vpow2.f32 %v1135_v50 }
0x115f   :  { %v1323_v26 = vpop.f32.mrb[10].mxu0 }
0x1160   :  { %v1061_v32 = vadd.f32 %v1323_v26, %v1700_v63  ;;  %v1055_v33 = vpop.f32.mrb[11].mxu0 }
0x1161   :  { %v1056_v34 = vadd.f32 %v1700_v63, %v1055_v33 }
0x1162   :  { %v1095_v35 = vmax.f32 %v1061_v32, 0.0 }
0x1163   :  { %v1094_v36 = vmax.f32 %v1056_v34, 0.0  ;;  %v1326_v37 = vpop.f32.mrb[12].mxu0 }
0x1164   :  { %v1449_v38 = vpop.eup %1448  ;;  %1103 = vst [vmem:[%s1754_s6 + $0x8] sm:$0xff] %v1095_v35  ;;  %v1071_v23 = vadd.f32 %v1326_v37, %v1700_v63  ;;  %v1065_v39 = vpop.f32.mrb[13].mxu0 }
0x1165   :  { %1102 = vst [vmem:[%s1754_s6] sm:$0xff] %v1094_v36  ;;  %v1066_v40 = vadd.f32 %v1700_v63, %v1065_v39  ;;  %858 = vrot.lane.b32.xlu0 %v1449_v38, %s1467_s21 }
0x1166   :  { %v1097_v42 = vmax.f32 %v1071_v23, 0.0  ;;  %v1451_v51 = vpop.eup %1450 }
0x1167   :  { %v1096_v43 = vmax.f32 %v1066_v40, 0.0  ;;  %v1329_v44 = vpop.f32.mrb[14].mxu0  ;;  %v852_v52 = vadd.f32 1.0, %v1451_v51 }
0x1168   :  { %1105 = vst [vmem:[%s1754_s6 + $0x18] sm:$0xff] %v1097_v42  ;;  %v1081_v45 = vadd.f32 %v1329_v44, %v1700_v63  ;;  %v1075_v46 = vpop.f32.mrb[15].mxu0 }
0x1169   :  { %1104 = vst [vmem:[%s1754_s6 + $0x10] sm:$0xff] %v1096_v43  ;;  %v1076_v47 = vadd.f32 %v1700_v63, %v1075_v46  ;;  %1452 = vrcp.f32 %v852_v52 }
0x116a   :  { %v1099_v48 = vmax.f32 %v1081_v45, 0.0 }
0x116b   :  { %v1098_v49 = vmax.f32 %v1076_v47, 0.0 }
0x116c   :  { %1107 = vst [vmem:[%s1754_s6 + $0x28] sm:$0xff] %v1099_v48 }
0x116d   :  { %1106 = vst [vmem:[%s1754_s6 + $0x20] sm:$0xff] %v1098_v49 }
0x1173   :  { %v1453_v53 = vpop.eup %1452 }
0x1174   :  { %v856_v56 = vmul.f32 %v1453_v53, %v1667_v17 }
0x11d7   :  { %v859_v54 = vpop.permute.xlu0 %858 }
0x11d8   :  { %v861_v55 = vmul.f32 %v1453_v53, %v859_v54 }
0x11da   :  { %863 = vrot.lane.b32.xlu1 %v861_v55, %s1468_s3 }
0x124c   :  { %v864_v57 = vpop.permute.xlu1 %863 }
0x124d   :  { %v866_v58 = vadd.f32 %v864_v57, %v856_v56 }
0x124f   :  { %1454 = vtanh.f32 %v866_v58 }
0x1259   :  { %v1455_v19 = vpop.eup %1454 }
0x125a   :  { %869 = vrot.lane.b32.xlu0 %v1455_v19, %s1467_s21 }
0x12cc   :  { %v870_v59 = vpop.permute.xlu0 %869 }
0x12cd   :  { %v872_v60 = vmul.f32 %v1453_v53, %v870_v59 }
0x12cf   :  { %874 = vrot.lane.b32.xlu1 %v872_v60, %s1468_s3 }
0x1341   :  { %v875_v61 = vpop.permute.xlu1 %874 }
0x1342   :  { %1311 = vmatmul.mubr.msk.f32.vlgmr.msra.gmra.mrb[12].mxu1 %vm174_vm2, %v875_v61  ;;  %1330 = vmatprep.mubr.msk.f32.mxu0 %vm174_vm2, %v875_v61 }
0x1415   :  { %v944_v0 = vpop.f32.mrb[12].mxu1 }
0x1416   :  { %v948_v1 = vadd.f32 %v944_v0, %v167_v62  ;;  %v1312_v2 = vpop.f32.mrb[13].mxu1 }
0x1418   :  { %1456 = vtanh.f32 %v948_v1  ;;  %v1137_v4 = vmul.f32 -1.442695, %v948_v1 }
0x141a   :  { %1458 = vpow2.f32 %v1137_v4 }
0x1422   :  { %v1457_v3 = vpop.eup %1456 }
0x1423   :  { %958 = vrot.lane.b32.xlu0 %v1457_v3, %s1467_s21 }
0x1424   :  { %v1459_v5 = vpop.eup %1458 }
0x1425   :  { %v952_v8 = vadd.f32 1.0, %v1459_v5 }
0x1427   :  { %1460 = vrcp.f32 %v952_v8 }
0x1431   :  { %v1461_v6 = vpop.eup %1460 }
0x1432   :  { %v956_v10 = vmul.f32 %v1461_v6, %v866_v58 }
0x1495   :  { %v959_v16 = vpop.permute.xlu0 %958 }
0x1496   :  { %v961_v7 = vmul.f32 %v1461_v6, %v959_v16 }
0x1498   :  { %963 = vrot.lane.b32.xlu1 %v961_v7, %s1468_s3 }
0x150a   :  { %v964_v15 = vpop.permute.xlu1 %963 }
0x150b   :  { %v966_v21 = vadd.f32 %v964_v15, %v956_v10 }
0x150d   :  { %1462 = vtanh.f32 %v966_v21 }
0x1517   :  { %v1463_v22 = vpop.eup %1462 }
0x1518   :  { %969 = vrot.lane.b32.xlu0 %v1463_v22, %s1467_s21 }
0x158a   :  { %v970_v9 = vpop.permute.xlu0 %969 }
0x158b   :  { %v972_v17 = vmul.f32 %v1461_v6, %v970_v9 }
0x158d   :  { %985 = vrot.lane.b32.xlu1 %v972_v17, %s1468_s3 }
0x15ff   :  { %v986_v11 = vpop.permute.xlu1 %985 }
0x1600   :  { %1331 = vmatmul.mubr.msk.f32.gmra.mrb[16].mxu0 %vm174_vm2, %v986_v11 }
0x16d3   :  { %v1332_v12 = vpop.f32.mrb[16].mxu0 }
0x16d4   :  { %v1091_v13 = vadd.f32 %v1332_v12, %v1700_v63  ;;  %v1085_v14 = vpop.f32.mrb[17].mxu0 }
0x16d5   :  { %v1086_v18 = vadd.f32 %v1700_v63, %v1085_v14 }
0x16d6   :  { %v1101_v20 = vmax.f32 %v1091_v13, 0.0 }
0x16d7   :  { %v1100_v24 = vmax.f32 %v1086_v18, 0.0 }
0x16d8   :  { %1109 = vst [vmem:[%s1754_s6 + $0x38] sm:$0xff] %v1101_v20 }
0x16d9   :  { %1108 = vst [vmem:[%s1754_s6 + $0x30] sm:$0xff] %v1100_v24 }

</bundles_post_ra>
